<compile_context>
chip_gen: v7x
topology: tpu7x:2x2x1
jax: 0.10.0
libtpu: 0.0.40
codegen_flags: <defaults>
</compile_context>

<pallas_src>
import functools

import jax
import jax.numpy as jnp
from jax.experimental import pallas as pl
from jax.experimental.pallas import tpu as pltpu

_LANES = 128


def _mccl_kernel(x_ref, out_ref, *, margins, fused_weights, pos_weight,
                 total_elems, num_cols, block_rows):
    pid = pl.program_id(0)
    x = x_ref[...].astype(jnp.float32)                       # (block_rows, 128)

    # Global flat element index of every lane in this block.
    row = jax.lax.broadcasted_iota(jnp.int32, x.shape, 0)
    lane = jax.lax.broadcasted_iota(jnp.int32, x.shape, 1)
    flat = (pid * block_rows + row) * _LANES + lane

    valid = flat < total_elems                                # mask padding / ragged tail
    is_pos = jax.lax.rem(flat, jnp.int32(num_cols)) == 0      # column 0 of each sample

    # Negative branch: sum_m relu(x - margin_m) * (w_m * neg_weight / num_negs).
    # Constants folded on the host; m=0 term initializes the accumulator.
    neg = jnp.maximum(x - margins[0], 0.0) * fused_weights[0]
    for m in range(1, len(margins)):
        neg = neg + jnp.maximum(x - margins[m], 0.0) * fused_weights[m]

    # Positive branch: pos_weight * relu(1 - x).
    pos = jnp.maximum(1.0 - x, 0.0) * pos_weight

    contrib = jnp.where(is_pos, pos, neg)
    contrib = jnp.where(valid, contrib, 0.0)

    # Per-lane partial sums (sublane reduce only); final tiny reduce in wrapper.
    out_ref[...] = jnp.sum(contrib, axis=0, keepdims=True)    # (1, 128)


def multi_cosine_contrastive_loss(y_pred, y_true, *, pos_weight, neg_weight,
                                  margin_values_list, negative_weights_list,
                                  block_rows_cap=512):
    del y_true  # unused in the reference forward pass
    B, C = y_pred.shape
    num_negs = C - 1
    total = B * C

    rows_needed = max(1, pl.cdiv(total, _LANES))
    block_rows = min(int(block_rows_cap), ((rows_needed + 7) // 8) * 8)
    num_blocks = pl.cdiv(rows_needed, block_rows)
    padded_rows = num_blocks * block_rows
    padded = padded_rows * _LANES

    flat = y_pred.reshape(-1)                 # free view of contiguous memory
    if padded != total:
        flat = jnp.pad(flat, (0, padded - total))
    x2d = flat.reshape(padded_rows, _LANES)   # lane-dense layout

    margins = tuple(float(m) for m in margin_values_list)
    fused_weights = tuple(
        float(w) * float(neg_weight) / float(num_negs)
        for w in negative_weights_list)

    kernel = functools.partial(
        _mccl_kernel,
        margins=margins,
        fused_weights=fused_weights,
        pos_weight=float(pos_weight),
        total_elems=total,
        num_cols=C,
        block_rows=block_rows,
    )

    block_bytes = block_rows * _LANES * x2d.dtype.itemsize
    # 2x double-buffered input + tiny output + generous compiler headroom;
    # stays well under the 64 MiB physical VMEM of v7x (and v5e's 16 MiB default).
    vmem_limit = min(32 * 1024 * 1024, max(8 * block_bytes, 4 * 1024 * 1024))

    partials = pl.pallas_call(
        kernel,
        out_shape=jax.ShapeDtypeStruct((num_blocks, _LANES), jnp.float32),
        grid=(num_blocks,),
        in_specs=[pl.BlockSpec((block_rows, _LANES), lambda i: (i, 0))],
        out_specs=pl.BlockSpec((1, _LANES), lambda i: (i, 0)),
        compiler_params=pltpu.CompilerParams(
            dimension_semantics=("parallel",),
            vmem_limit_bytes=vmem_limit),
        cost_estimate=pl.CostEstimate(
            flops=total * (4 * len(margins) + 4),
            transcendentals=0,
            bytes_accessed=padded * x2d.dtype.itemsize + num_blocks * _LANES * 4),
    )(x2d)

    # Tiny final reduce + mean over the *global* batch size.
    return jnp.sum(partials) / jnp.float32(B)


def _reference_loss(y_pred, pos_weight, neg_weight, margins, weights):
    # Pure-JAX transcription of the PyTorch forward, for validation.
    y_pred = y_pred.astype(jnp.float32)
    pos_logits = y_pred[:, 0]
    neg_logits = y_pred[:, 1:]
    pos_loss = jnp.maximum(1.0 - pos_logits, 0.0)
    neg_losses = jnp.maximum(neg_logits[:, None, :] - margins[:, None], 0.0) \
        * weights[:, None]
    neg_loss = neg_losses.sum(axis=1).mean(axis=-1)
    return (pos_weight * pos_loss + neg_weight * neg_loss).mean()


if __name__ == "__main__":
    pos_weight = 1.0
    neg_weight = 0.5
    margin_values_list = [0.9, 0.7, 0.5, 0.3]
    negative_weights_list = [1.0, 0.8, 0.6, 0.4]
    margins_arr = jnp.asarray(margin_values_list, jnp.float32)
    weights_arr = jnp.asarray(negative_weights_list, jnp.float32)

    key = jax.random.PRNGKey(0)
    k1, k2 = jax.random.split(key)

    # Case 1: small batch (single block, padded lane-dense slab).
    batch, num_negs = 8, 7
    y_pred = jax.random.uniform(k1, (batch, 1 + num_negs),
                                minval=-1.0, maxval=1.0, dtype=jnp.float32)
    y_true = jnp.concatenate(
        [jnp.ones((batch, 1), jnp.float32),
         jnp.zeros((batch, num_negs), jnp.float32)], axis=1)  # unused by forward

    loss = multi_cosine_contrastive_loss(
        y_pred, y_true,
        pos_weight=pos_weight, neg_weight=neg_weight,
        margin_values_list=margin_values_list,
        negative_weights_list=negative_weights_list)
    loss = jax.block_until_ready(loss)
    ref = jax.block_until_ready(
        _reference_loss(y_pred, pos_weight, neg_weight, margins_arr, weights_arr))
    assert jnp.allclose(loss, ref, rtol=1e-5, atol=1e-5), (loss, ref)

    # Case 2: multi-block grid + ragged tail (exercises tiling / masking path).
    batch2, num_negs2 = 200, 19
    y_pred2 = jax.random.uniform(k2, (batch2, 1 + num_negs2),
                                 minval=-1.0, maxval=1.0, dtype=jnp.float32)
    y_true2 = jnp.zeros_like(y_pred2)
    loss2 = multi_cosine_contrastive_loss(
        y_pred2, y_true2,
        pos_weight=pos_weight, neg_weight=neg_weight,
        margin_values_list=margin_values_list,
        negative_weights_list=negative_weights_list,
        block_rows_cap=8)  # force several grid steps at small size
    loss2 = jax.block_until_ready(loss2)
    ref2 = jax.block_until_ready(
        _reference_loss(y_pred2, pos_weight, neg_weight, margins_arr, weights_arr))
    assert jnp.allclose(loss2, ref2, rtol=1e-5, atol=1e-5), (loss2, ref2)

    print("KERNEL_OK")
</pallas_src>

<mosaic_0001>
module attributes {stable_mosaic.version = 11 : i64} {
  func.func @_mccl_kernel(%arg0: i32, %arg1: memref<8x128xf32, #tpu.memory_space<vmem>>, %arg2: memref<1x128xf32, #tpu.memory_space<vmem>>) attributes {dimension_semantics = [#tpu.dimension_semantics<parallel>], iteration_bounds = array<i64: 1>, scalar_prefetch = 0 : i64, scratch_operands = 0 : i64, tpu.core_type = #tpu.core_type<tc>, window_params = [{transform_indices = @transform_0, window_bounds = array<i64: 8, 128>}, {transform_indices = @transform_1, window_bounds = array<i64: 1, 128>}]} {
    %c0 = arith.constant 0 : index
    %c0_0 = arith.constant 0 : index
    %0 = vector.load %arg1[%c0, %c0_0] : memref<8x128xf32, #tpu.memory_space<vmem>>, vector<8x128xf32>
    %1 = tpu.iota {dimensions = array<i32: 0>} : vector<8x128xi32>
    %2 = tpu.iota {dimensions = array<i32: 1>} : vector<8x128xi32>
    %c8_i32 = arith.constant 8 : i32
    %3 = arith.muli %arg0, %c8_i32 : i32
    %4 = vector.broadcast %3 : i32 to vector<8x128xi32>
    %5 = arith.addi %4, %1 : vector<8x128xi32>
    %c128_i32 = arith.constant 128 : i32
    %6 = vector.broadcast %c128_i32 : i32 to vector<8x128xi32>
    %7 = arith.muli %5, %6 : vector<8x128xi32>
    %8 = arith.addi %7, %2 : vector<8x128xi32>
    %c64_i32 = arith.constant 64 : i32
    %9 = vector.broadcast %c64_i32 : i32 to vector<8x128xi32>
    %10 = arith.cmpi slt, %8, %9 : vector<8x128xi32>
    %c8_i32_1 = arith.constant 8 : i32
    %11 = vector.broadcast %c8_i32_1 : i32 to vector<8x128xi32>
    %12 = arith.remsi %8, %11 : vector<8x128xi32>
    %c0_i32 = arith.constant 0 : i32
    %13 = vector.broadcast %c0_i32 : i32 to vector<8x128xi32>
    %14 = arith.cmpi eq, %12, %13 : vector<8x128xi32>
    %cst = arith.constant 0.899999976 : f32
    %15 = vector.broadcast %cst : f32 to vector<8x128xf32>
    %16 = arith.subf %0, %15 : vector<8x128xf32>
    %cst_2 = arith.constant 0.000000e+00 : f32
    %17 = vector.broadcast %cst_2 : f32 to vector<8x128xf32>
    %18 = arith.maximumf %16, %17 : vector<8x128xf32>
    %cst_3 = arith.constant 0.0714285746 : f32
    %19 = vector.broadcast %cst_3 : f32 to vector<8x128xf32>
    %20 = arith.mulf %18, %19 : vector<8x128xf32>
    %cst_4 = arith.constant 0.699999988 : f32
    %21 = vector.broadcast %cst_4 : f32 to vector<8x128xf32>
    %22 = arith.subf %0, %21 : vector<8x128xf32>
    %cst_5 = arith.constant 0.000000e+00 : f32
    %23 = vector.broadcast %cst_5 : f32 to vector<8x128xf32>
    %24 = arith.maximumf %22, %23 : vector<8x128xf32>
    %cst_6 = arith.constant 0.0571428575 : f32
    %25 = vector.broadcast %cst_6 : f32 to vector<8x128xf32>
    %26 = arith.mulf %24, %25 : vector<8x128xf32>
    %27 = arith.addf %20, %26 : vector<8x128xf32>
    %cst_7 = arith.constant 5.000000e-01 : f32
    %28 = vector.broadcast %cst_7 : f32 to vector<8x128xf32>
    %29 = arith.subf %0, %28 : vector<8x128xf32>
    %cst_8 = arith.constant 0.000000e+00 : f32
    %30 = vector.broadcast %cst_8 : f32 to vector<8x128xf32>
    %31 = arith.maximumf %29, %30 : vector<8x128xf32>
    %cst_9 = arith.constant 0.042857144 : f32
    %32 = vector.broadcast %cst_9 : f32 to vector<8x128xf32>
    %33 = arith.mulf %31, %32 : vector<8x128xf32>
    %34 = arith.addf %27, %33 : vector<8x128xf32>
    %cst_10 = arith.constant 3.000000e-01 : f32
    %35 = vector.broadcast %cst_10 : f32 to vector<8x128xf32>
    %36 = arith.subf %0, %35 : vector<8x128xf32>
    %cst_11 = arith.constant 0.000000e+00 : f32
    %37 = vector.broadcast %cst_11 : f32 to vector<8x128xf32>
    %38 = arith.maximumf %36, %37 : vector<8x128xf32>
    %cst_12 = arith.constant 0.0285714287 : f32
    %39 = vector.broadcast %cst_12 : f32 to vector<8x128xf32>
    %40 = arith.mulf %38, %39 : vector<8x128xf32>
    %41 = arith.addf %34, %40 : vector<8x128xf32>
    %cst_13 = arith.constant 1.000000e+00 : f32
    %42 = vector.broadcast %cst_13 : f32 to vector<8x128xf32>
    %43 = arith.subf %42, %0 : vector<8x128xf32>
    %cst_14 = arith.constant 0.000000e+00 : f32
    %44 = vector.broadcast %cst_14 : f32 to vector<8x128xf32>
    %45 = arith.maximumf %43, %44 : vector<8x128xf32>
    %cst_15 = arith.constant 1.000000e+00 : f32
    %46 = vector.broadcast %cst_15 : f32 to vector<8x128xf32>
    %47 = arith.mulf %45, %46 : vector<8x128xf32>
    %48 = arith.select %14, %47, %41 : vector<8x128xi1>, vector<8x128xf32>
    %cst_16 = arith.constant 0.000000e+00 : f32
    %49 = vector.broadcast %cst_16 : f32 to vector<8x128xf32>
    %50 = arith.select %10, %48, %49 : vector<8x128xi1>, vector<8x128xf32>
    %cst_17 = arith.constant dense<0.000000e+00> : vector<128xf32>
    %51 = vector.multi_reduction <add>, %50, %cst_17 [0] : vector<8x128xf32> to vector<128xf32>
    %52 = vector.shape_cast %51 : vector<128xf32> to vector<1x128xf32>
    %c0_18 = arith.constant 0 : index
    %c0_19 = arith.constant 0 : index
    %53 = vector.load %arg2[%c0_18, %c0_19] : memref<1x128xf32, #tpu.memory_space<vmem>>, vector<1x128xf32>
    tpu.vector_store %arg2[%c0_18, %c0_19], %52 {strides = array<i32>} : memref<1x128xf32, #tpu.memory_space<vmem>>, vector<1x128xf32>,
    return
  }
  func.func @transform_0(%arg0: i32) -> (i32, i32) {
    %c0_i32 = arith.constant 0 : i32
    %c0_i32_0 = arith.constant 0 : i32
    return %arg0, %c0_i32 : i32, i32
  }
  func.func @transform_1(%arg0: i32) -> (i32, i32) {
    %c0_i32 = arith.constant 0 : i32
    %c0_i32_0 = arith.constant 0 : i32
    return %arg0, %c0_i32 : i32, i32
  }
}

</mosaic_0001>

<bundles_post_ra>
// kernel: tpu_custom_call.1
= control target key start
LH: loop header
LB: loop body
LE: loop exit
PB: predicated region body
PF: predicated region fallthrough
CT: control target
= control target key end

     0   :  { %6 = vsyncpa [#allocation3], 0  ;;  %s172_s0 = inlined_call_operand.hbm [shape: f32[8,128], index: 0, kind: input, shape index: {}]   ;;  %s173_s1 = inlined_call_operand.hbm [shape: f32[1,128], index: 1, kind: output, shape index: {}]  }
   0x1   :  { %7 = vsyncpa [#allocation4], 0  ;;  %s136_s6 = smov [#allocation2]   ;;  %s88_s10 = scalar_lea.hbm %s172_s0, 128 }
   0x2   :  { %s14_s7 = sshll.u32 %s136_s6, 4  ;;  %p89_p0 = scmp.ne.s32.totalorder %s172_s0, %s88_s10  ;;  %s15_s7 = int_to_ptr.vmem [resolvable:$true] %s14_s7 }
   0x3   :  { %p92_p1 = scmp.lt.u32.totalorder %s88_s10, %s172_s0 }
   0x5   :  { %p94_p2 = pnand %p92_p1, %p89_p0 }
   0x7   :  { %97 = shalt.err (!%p94_p2)
}
   0x8   :  { %s98_s15 = scalar_lea.vmem %s15_s7, 128  ;;  %p103_p4 = scmp.lt.s32.totalorder %s15_s7, %s15_s7 }
   0x9   :  { %p99_p3 = scmp.ne.s32.totalorder %s15_s7, %s98_s15  ;;  %p104_p5 = scmp.lt.s32.totalorder %s98_s15, %s98_s15 }
   0xb   :  { %p105_p6 = por %p104_p5, %p103_p4 }
   0xd   :  { %p106_p7 = pnand %p105_p6, %p99_p3 }
   0xf   :  { %109 = shalt.err (!%p106_p7)
}
  0x10   :  { %17 = dma.hbm_to_vmem [thread:$0]  %s172_s0, 128, %s15_s7, [#allocation3]  }
  0x11   :  { %132 = dma.done.wait [#allocation3], 128  }
  0x12   :  { %133 = vsyncadd [#allocation3], 4294967168  ;;  %v22_v0 = vlaneseq  ;;  %v21_v5 = vld [vmem:[#allocation2] sm:$0xff]  ;;  %s137_s0 = smov [#allocation5]  }
  0x13   :  { %v82_v7 = vadd.f32 -0.9, %v21_v5  ;;  %v83_v8 = vadd.f32 -0.7, %v21_v5  ;;  %v84_v9 = vadd.f32 -0.5, %v21_v5  ;;  %v55_v20 = vsub.f32 1.0, %v21_v5 }
  0x14   :  { %v23_v1 = vshrl.u32 %v22_v0, 7  ;;  %v25_v2 = vand.u32 127, %v22_v0  ;;  %v85_v10 = vadd.f32 -0.3, %v21_v5  ;;  %s72_s18 = sshll.u32 %s137_s0, 4  ;;  %s73_s18 = int_to_ptr.vmem [resolvable:$true] %s72_s18 }
  0x15   :  { %v41_v12 = vmax.f32 %v82_v7, 0.0  ;;  %v44_v13 = vmax.f32 %v83_v8, 0.0  ;;  %v48_v14 = vmax.f32 %v84_v9, 0.0  ;;  %v56_v26 = vmax.f32 %v55_v20, 0.0  ;;  %s110_s19 = scalar_lea.vmem %s73_s18, 16  ;;  %s114_s20 = scalar_lea.vmem %s73_s18, 32 }
  0x16   :  { %v29_v3 = vmul.u32 128, %v23_v1  ;;  %v52_v15 = vmax.f32 %v85_v10, 0.0  ;;  %p111_p8 = scmp.ne.s32.totalorder %s73_s18, %s110_s19  ;;  %p115_p9 = scmp.lt.s32.totalorder %s73_s18, %s73_s18 }
  0x17   :  { %v42_v17 = vmul.f32 0.071428575, %v41_v12  ;;  %v45_v18 = vmul.f32 0.057142857, %v44_v13  ;;  %v49_v19 = vmul.f32 0.042857144, %v48_v14  ;;  %p116_p10 = scmp.lt.s32.totalorder %s114_s20, %s110_s19 }
  0x18   :  { %v30_v4 = vadd.s32 %v29_v3, %v25_v2  ;;  %v53_v23 = vmul.f32 0.028571429, %v52_v15 }
  0x19   :  { %v46_v22 = vadd.f32 %v45_v18, %v42_v17  ;;  %p117_p11 = por %p116_p10, %p115_p9 }
  0x1a   :  { %v33_v6 = vsub.s32 0, %v30_v4  ;;  %vm32_vm0 = vcmp.lt.s32.totalorder %v30_v4, 0  ;;  %vm31_vm2 = vcmp.lt.s32.totalorder %v30_v4, 64 }
  0x1b   :  { %v50_v25 = vadd.f32 %v49_v19, %v46_v22  ;;  %p118_p12 = pnand %p117_p11, %p111_p8 }
  0x1c   :  { %v81_v11 = vmin.u32 %v33_v6, %v30_v4 }
  0x1d   :  { %v54_v27 = vadd.f32 %v53_v23, %v50_v25 }
  0x1e   :  { %v36_v16 = vand.u32 7, %v81_v11 }
  0x20   :  { %v37_v21 = vsub.s32 0, %v36_v16 }
  0x22   :  { %v38_v24 = vsel %vm32_vm0, %v37_v21, %v36_v16 }
  0x23   :  { %vm39_vm1 = vcmp.eq.s32.totalorder %v38_v24, 0 }
  0x24   :  { %v57_v28 = vsel %vm39_vm1, %v56_v26, %v54_v27 }
  0x25   :  { %v58_v29 = vsel %vm31_vm2, %v57_v28, 0.0 }
  0x26   :  { %v59_v30 = vrot.slane %v58_v29, 4 }
  0x28   :  { %v60_v31 = vadd.f32 %v59_v30, %v58_v29 }
  0x2a   :  { %v61_v32 = vrot.slane %v60_v31, 2 }
  0x2c   :  { %v62_v33 = vadd.f32 %v61_v32, %v60_v31 }
  0x2e   :  { %v63_v34 = vrot.slane %v62_v33, 1 }
  0x30   :  { %v64_v35 = vadd.f32 %v63_v34, %v62_v33 }
  0x32   :  { %65 = vst [vmem:[#allocation5] sm:$0x1] %v64_v35 }
  0x33   :  { %121 = shalt.err (!%p118_p12)
}
  0x34   :  { %s122_s23 = scalar_lea.hbm %s173_s1, 16 }
  0x35   :  { %p123_p13 = scmp.ne.s32.totalorder %s173_s1, %s122_s23  ;;  %p126_p0 = scmp.lt.u32.totalorder %s122_s23, %s173_s1 }
  0x37   :  { %p128_p1 = pnand %p126_p0, %p123_p13 }
  0x39   :  { %131 = shalt.err (!%p128_p1)
}
  0x3a   :  { %75 = dma.vmem_to_hbm [thread:$0]  %s73_s18, 16, %s173_s1, [#allocation4]  }
  0x3b   :  { %134 = dma.done.wait [#allocation4], 16  }
  0x3c   :  { %135 = vsyncadd [#allocation4], 4294967280 }
  0x3d   :  { %79 = vsyncpa [#allocation3], 1 }
  0x3e   :  { %80 = vsyncpa [#allocation4], 1 }

</bundles_post_ra>
